<compile_context>
chip_gen: v5e
topology: v5e:2x2
jax: 0.10.0
libtpu: 0.0.40
codegen_flags: <defaults>
</compile_context>

<pallas_src>
import functools

import jax
import jax.numpy as jnp
from jax.experimental import pallas as pl
from jax.experimental.pallas import tpu as pltpu


IN_FEATURES = 24
OUT_FEATURES = 48


def _linear_relu_kernel(x_ref, w_ref, b_ref, o_ref):
    # out = relu(x @ W + b_eff); the "+1" is already folded into b_eff.
    acc = jnp.dot(x_ref[...], w_ref[...], preferred_element_type=jnp.float32)
    acc = acc + b_ref[...]                 # (1, OUT) broadcasts over rows
    o_ref[...] = jnp.maximum(acc, 0.0).astype(o_ref.dtype)


def prepare_params(w, b):
    """One-time parameter prep (hoisted out of the forward pass).

    Folds the '+1' into an effective bias:
        (x + 1) @ W + b == x @ W + (b + W.sum(0))
    Returns (w, b_eff) with b_eff shaped (1, OUT) so the kernel just broadcasts.
    """
    b_eff = (b + jnp.sum(w, axis=0)).reshape(1, -1)
    return w, b_eff


@functools.partial(jax.jit, static_argnames=("tm",))
def model_forward(x, w, b_eff, *, tm=8192):
    """x: (B, 24) f32, w: (24, 48) f32, b_eff: (1, 48) f32 -> (B, 48) f32."""
    B, IN = x.shape
    OUT = w.shape[1]

    cost = pl.CostEstimate(
        flops=2 * B * IN * OUT + B * OUT,
        transcendentals=0,
        bytes_accessed=4 * (B * IN + IN * OUT + OUT + B * OUT),
    )

    if B <= tm:
        # Small / medium batch: no grid at all — whole arrays as single VMEM
        # blocks (<= ~2.3 MiB even at B == tm), one DMA in / one DMA out,
        # zero pipeline bookkeeping.
        vmem = pl.BlockSpec(memory_space=pltpu.MemorySpace.VMEM)
        return pl.pallas_call(
            _linear_relu_kernel,
            out_shape=jax.ShapeDtypeStruct((B, OUT), x.dtype),
            in_specs=[vmem, vmem, vmem],
            out_specs=vmem,
            cost_estimate=cost,
        )(x, w, b_eff)

    # Large batch: big row tiles, BlockSpec double-buffered HBM<->VMEM pipeline,
    # "parallel" row axis for v7x dual-TC sharding.  Ragged last block (when
    # B % tm != 0) is handled by Pallas's masked partial-block stores.
    return pl.pallas_call(
        _linear_relu_kernel,
        out_shape=jax.ShapeDtypeStruct((B, OUT), x.dtype),
        grid_spec=pltpu.PrefetchScalarGridSpec(
            num_scalar_prefetch=0,
            grid=(pl.cdiv(B, tm),),
            in_specs=[
                pl.BlockSpec((tm, IN), lambda i: (i, 0)),
                pl.BlockSpec((IN, OUT), lambda i: (0, 0)),
                pl.BlockSpec((1, OUT), lambda i: (0, 0)),
            ],
            out_specs=pl.BlockSpec((tm, OUT), lambda i: (i, 0)),
        ),
        compiler_params=pltpu.CompilerParams(
            dimension_semantics=("parallel",),
        ),
        cost_estimate=cost,
    )(x, w, b_eff)


if __name__ == "__main__":
    key = jax.random.PRNGKey(0)
    k_x, k_w, k_b = jax.random.split(key, 3)

    B = 2

    # Deterministic init (mimics nn.Linear default: U(-1/sqrt(in), 1/sqrt(in))).
    bound = 1.0 / jnp.sqrt(jnp.float32(IN_FEATURES))
    w = jax.random.uniform(k_w, (IN_FEATURES, OUT_FEATURES), jnp.float32, -bound, bound)
    b = jax.random.uniform(k_b, (OUT_FEATURES,), jnp.float32, -bound, bound)

    x = jax.random.normal(k_x, (B, IN_FEATURES), jnp.float32)

    # Parameter prep happens once, outside the forward pass.
    w_prep, b_eff = prepare_params(w, b)

    out = model_forward(x, w_prep, b_eff)
    jax.block_until_ready(out)

    # Reference check in plain JAX (original un-folded formulation).
    ref = jnp.maximum((x + 1.0) @ w + b, 0.0)
    assert out.shape == (B, OUT_FEATURES)
    assert jnp.allclose(out, ref, atol=1e-4, rtol=1e-4)

    print("KERNEL_OK")
</pallas_src>

<mosaic_0001>
module attributes {stable_mosaic.version = 11 : i64} {
  func.func @_linear_relu_kernel(%arg0: memref<2x24xf32, #tpu.memory_space<vmem>>, %arg1: memref<24x48xf32, #tpu.memory_space<vmem>>, %arg2: memref<1x48xf32, #tpu.memory_space<vmem>>, %arg3: memref<2x48xf32, #tpu.memory_space<vmem>>) attributes {dimension_semantics = [], scalar_prefetch = 0 : i64, scratch_operands = 0 : i64, tpu.core_type = #tpu.core_type<tc>} {
    %c0 = arith.constant 0 : index
    %c0_0 = arith.constant 0 : index
    %0 = vector.load %arg0[%c0, %c0_0] : memref<2x24xf32, #tpu.memory_space<vmem>>, vector<2x24xf32>
    %c0_1 = arith.constant 0 : index
    %c0_2 = arith.constant 0 : index
    %1 = vector.load %arg1[%c0_1, %c0_2] : memref<24x48xf32, #tpu.memory_space<vmem>>, vector<24x48xf32>
    %cst = arith.constant dense<0.000000e+00> : vector<2x48xf32>
    %2 = tpu.matmul %0, %1, %cst {dimension_numbers = #tpu.dot_dimension_numbers<[1], [0], [0], [1], [0, 0, 1, 1], [], []>} : vector<2x24xf32>, vector<24x48xf32>, vector<2x48xf32> -> vector<2x48xf32>
    %c0_3 = arith.constant 0 : index
    %c0_4 = arith.constant 0 : index
    %3 = vector.load %arg2[%c0_3, %c0_4] : memref<1x48xf32, #tpu.memory_space<vmem>>, vector<1x48xf32>
    %4 = vector.broadcast %3 : vector<1x48xf32> to vector<2x48xf32>
    %5 = arith.addf %2, %4 : vector<2x48xf32>
    %cst_5 = arith.constant 0.000000e+00 : f32
    %6 = vector.broadcast %cst_5 : f32 to vector<2x48xf32>
    %7 = arith.maximumf %5, %6 : vector<2x48xf32>
    %c0_6 = arith.constant 0 : index
    %c0_7 = arith.constant 0 : index
    %8 = vector.load %arg3[%c0_6, %c0_7] : memref<2x48xf32, #tpu.memory_space<vmem>>, vector<2x48xf32>
    tpu.vector_store %arg3[%c0_6, %c0_7], %7 {strides = array<i32>} : memref<2x48xf32, #tpu.memory_space<vmem>>, vector<2x48xf32>,
    return
  }
}

</mosaic_0001>

<bundles_post_ra>
// kernel: model_forward.1
= control target key start
LH: loop header
LB: loop body
LE: loop exit
PB: predicated region body
PF: predicated region fallthrough
CT: control target
= control target key end

     0   :  { %8 = vsyncpa [#allocation3], 0  ;;  %s220_s0 = inlined_call_operand.hbm [shape: f32[2,24], index: 0, kind: input, shape index: {}]   ;;  %s221_s1 = inlined_call_operand.hbm [shape: f32[24,48], index: 1, kind: input, shape index: {}]   ;;  %s222_s2 = inlined_call_operand.vmem [shape: f32[1,48], index: 2, kind: input, shape index: {}]   ;;  %s223_s3 = inlined_call_operand.hbm [shape: f32[2,48], index: 3, kind: output, shape index: {}]  }
   0x1   :  { %9 = vsyncpa [#allocation6], 0 }
   0x2   :  { %10 = vsyncpa [#allocation4], 0  ;;  %s16_s14 = sshll.u32 %s220_s0, 4  ;;  %s183_s15 = smov [#allocation2]   ;;  %s17_s14 = int_to_ptr.hbm [resolvable:$true] %s16_s14 }
   0x3   :  { %s18_s16 = sshll.u32 %s183_s15, 4  ;;  %s26_s19 = sshll.u32 %s221_s1, 4  ;;  %s19_s16 = int_to_ptr.vmem [resolvable:$true] %s18_s16  ;;  %s27_s19 = int_to_ptr.hbm [resolvable:$true] %s26_s19 }
   0x4   :  { %21 = dma.hbm_to_vmem [thread:$0]  %s17_s14, 32, %s19_s16, [#allocation3]  }
   0x5   :  { %s184_s20 = smov [#allocation5]   ;;  %s185_s22 = smov 128  }
   0x6   :  { %s28_s21 = sshll.u32 %s184_s20, 4  ;;  %s186_s23 = smov 8   ;;  %s29_s21 = int_to_ptr.vmem [resolvable:$true] %s28_s21 }
   0x7   :  { %34 = dma.hbm_to_vmem [thread:$0]  %s27_s19, 384, %s29_s21, [#allocation6], %s185_s22, %s185_s22, %s186_s23  }
   0x8   :  { %177 = dma.done.wait [#allocation3], 32  }
   0x9   :  { %178 = vsyncadd [#allocation3], 4294967264 }
   0xa   :  { %179 = dma.done.wait [#allocation6], 384  }
   0xb   :  { %180 = vsyncadd [#allocation6], 4294966912  ;;  %v48_v0 = vld [vmem:[#allocation5 + $0x10] sm:$0xff]  ;;  %v47_v1 = vld [vmem:[#allocation5 + $0x8] sm:$0xff]  ;;  %vm53_vm0 = vcmask 195584   ;;  %s187_s24 = smov [#allocation7]  }
   0xc   :  { %70 = vmatpush.msra.mxu0 %v48_v0  ;;  %v46_v2 = vld [vmem:[#allocation5] sm:$0xff]  ;;  %v45_v3 = vld [vmem:[#allocation2] sm:$0x3]  ;;  %s85_s25 = sshll.u32 %s187_s24, 4  ;;  %s87_s28 = sshll.u32 %s223_s3, 4  ;;  %vm78_vm1 = vcmask 386048   ;;  %s86_s25 = int_to_ptr.vmem [resolvable:$true] %s85_s25  ;;  %s88_s28 = int_to_ptr.hbm [resolvable:$true] %s87_s28 }
   0xd   :  { %v104_v4 = vld [vmem:[%s222_s2] ss:$0 sm:$0xff] }
   0xe   :  { %71 = vmatpush.msra.mxu0 %v47_v1 }
  0x10   :  { %72 = vmatpush.msra.mxu0 %v46_v2 }
  0x11   :  { %98 = vmatmul.msk.f32.vlgmr.msra.gmra.mxu0 %vm53_vm0, %v45_v3 }
  0x8e   :  { %v74_v5 = vpop.f32.mrf.mxu0 }
  0x8f   :  { %v75_v6 = vadd.f32 %v104_v4, %v74_v5 }
  0x91   :  { %v77_v7 = vmax.f32 %v75_v6, 0.0 }
  0x93   :  { %79 = vst.msk [vmem:[#allocation7] sm:$0x3] %vm78_vm1, %v77_v7 }
  0x94   :  { %90 = dma.vmem_to_hbm [thread:$0]  %s86_s25, 32, %s88_s28, [#allocation4]  }
  0x95   :  { %181 = dma.done.wait [#allocation4], 32  }
  0x96   :  { %182 = vsyncadd [#allocation4], 4294967264 }
  0x97   :  { %95 = vsyncpa [#allocation3], 1 }
  0x98   :  { %96 = vsyncpa [#allocation6], 1 }
  0x99   :  { %97 = vsyncpa [#allocation4], 1 }

</bundles_post_ra>
